<compile_context>
chip_gen: v5e
topology: v5e:2x2
jax: 0.10.0
libtpu: 0.0.40
codegen_flags: <defaults>
</compile_context>

<pallas_src>
import functools

import jax
import jax.numpy as jnp
from jax.experimental import pallas as pl
from jax.experimental.pallas import tpu as pltpu


# ----------------------------------------------------------------------------
# Pass 1: per-channel moments over N*H*W (data-dependent init path only).
# ----------------------------------------------------------------------------
def _stats_kernel(hw, m_total, h_ref, t_ref, logs_ref, sum_ref, sq_ref):
    # h_ref: (1, C, T) input tile ; t_ref / logs_ref: (C, 1) f32 outputs
    # sum_ref / sq_ref: (C, 1) f32 VMEM accumulators (persist across the grid).
    n = pl.program_id(0)
    j = pl.program_id(1)
    is_first = jnp.logical_and(n == 0, j == 0)
    is_last = jnp.logical_and(n == pl.num_programs(0) - 1,
                              j == pl.num_programs(1) - 1)

    @pl.when(is_first)
    def _():
        sum_ref[...] = jnp.zeros_like(sum_ref)
        sq_ref[...] = jnp.zeros_like(sq_ref)

    h = h_ref[0].astype(jnp.float32)          # (C, T)
    tile = h.shape[1]
    if hw % tile != 0:
        # Partial last tile along H*W: zero out-of-bounds lanes (zeros are
        # neutral for both sum and sum-of-squares; true count m_total is used
        # in the finalize step).
        lane = jax.lax.broadcasted_iota(jnp.int32, h.shape, 1)
        valid = hw - j * tile
        h = jnp.where(lane < valid, h, 0.0)

    sum_ref[...] += jnp.sum(h, axis=1, keepdims=True)
    sq_ref[...] += jnp.sum(h * h, axis=1, keepdims=True)

    @pl.when(is_last)
    def _():
        s = sum_ref[...]
        q = sq_ref[...]
        mean = s / m_total
        # Unbiased variance (torch .std() default) via one-pass moments (f32).
        var = jnp.maximum((q - s * s / m_total) / (m_total - 1.0), 0.0)
        std = jnp.sqrt(var)
        t_ref[...] = -mean
        logs_ref[...] = -jnp.log(std + 1e-7)   # == log(1/(std+1e-7))


# ----------------------------------------------------------------------------
# Pass 2: tiled elementwise affine  out = scale * (h + t).
# ----------------------------------------------------------------------------
def _affine_kernel(h_ref, t_ref, scale_ref, out_ref):
    h = h_ref[...].astype(jnp.float32)                     # (1, C, T)
    out_ref[...] = (scale_ref[...] * (h + t_ref[...])).astype(out_ref.dtype)


def _pick_tile(c, hw, bytes_per_elem=4, budget=2 * 1024 * 1024):
    """Lane-tile: multiple of 128 (or full HW when tiny), <= ~2 MiB/buffer."""
    if hw <= 128:
        return hw                                   # full dim satisfies layout
    max_t = max(128, (budget // (c * bytes_per_elem)) // 128 * 128)
    aligned = (hw // 128) * 128                     # largest 128-multiple <= hw
    return min(aligned, max_t)


def glow_actnorm_forward(h, t, logs, initialized: bool):
    """h: (N, C, H, W); t, logs: (1, C, 1, 1) float32.

    Returns (out NCHW, logdet scalar, t_used (1,C,1,1), logs_used (1,C,1,1)).
    `initialized` is a Python bool and is specialized at trace time.
    """
    n, c, hh, ww = h.shape
    hw = hh * ww
    m = n * hw
    assert m > 1, "ActNorm data-dependent init requires more than one sample."

    h3 = h.reshape(n, c, hw)                  # free view: no data movement
    tile = _pick_tile(c, hw)
    grid = (n, pl.cdiv(hw, tile))
    itemsize = jnp.dtype(h.dtype).itemsize

    if initialized:
        t_used = t.reshape(c, 1).astype(jnp.float32)
        logs_used = logs.reshape(c, 1).astype(jnp.float32)
    else:
        t_used, logs_used = pl.pallas_call(
            functools.partial(_stats_kernel, hw, float(m)),
            out_shape=(
                jax.ShapeDtypeStruct((c, 1), jnp.float32),
                jax.ShapeDtypeStruct((c, 1), jnp.float32),
            ),
            grid_spec=pltpu.PrefetchScalarGridSpec(
                num_scalar_prefetch=0,
                grid=grid,
                in_specs=[pl.BlockSpec((1, c, tile), lambda i, j: (i, 0, j))],
                out_specs=(pl.BlockSpec((c, 1), lambda i, j: (0, 0)),
                           pl.BlockSpec((c, 1), lambda i, j: (0, 0))),
                scratch_shapes=[pltpu.VMEM((c, 1), jnp.float32),
                                pltpu.VMEM((c, 1), jnp.float32)],
            ),
            compiler_params=pltpu.CompilerParams(
                dimension_semantics=("arbitrary", "arbitrary")),
            cost_estimate=pl.CostEstimate(
                flops=3 * m * c, transcendentals=2 * c,
                bytes_accessed=m * c * itemsize),
        )(h3)

    scale = jnp.exp(logs_used)                # (C, 1) f32, tiny host-graph op

    out3 = pl.pallas_call(
        _affine_kernel,
        out_shape=jax.ShapeDtypeStruct((n, c, hw), h.dtype),
        grid_spec=pltpu.PrefetchScalarGridSpec(
            num_scalar_prefetch=0,
            grid=grid,
            in_specs=[pl.BlockSpec((1, c, tile), lambda i, j: (i, 0, j)),
                      pl.BlockSpec((c, 1), lambda i, j: (0, 0)),
                      pl.BlockSpec((c, 1), lambda i, j: (0, 0))],
            out_specs=pl.BlockSpec((1, c, tile), lambda i, j: (i, 0, j)),
        ),
        compiler_params=pltpu.CompilerParams(
            dimension_semantics=("parallel", "parallel")),
        cost_estimate=pl.CostEstimate(
            flops=2 * m * c, transcendentals=0,
            bytes_accessed=2 * m * c * itemsize),
    )(h3, t_used, scale)

    out = out3.reshape(n, c, hh, ww)          # free view back to NCHW
    logdet = jnp.sum(logs_used) * (hh * ww)
    return out, logdet, t_used.reshape(1, c, 1, 1), logs_used.reshape(1, c, 1, 1)


# ----------------------------------------------------------------------------
# Pure-JAX reference (port of the PyTorch forward) for verification.
# ----------------------------------------------------------------------------
def _reference(h, t, logs, initialized: bool):
    n, c, hh, ww = h.shape
    if not initialized:
        flat = jnp.transpose(h, (1, 0, 2, 3)).reshape(c, -1)
        mean = flat.mean(axis=1)
        std = jnp.std(flat, axis=1, ddof=1)   # torch default: unbiased
        t = (-mean).reshape(1, c, 1, 1)
        logs = jnp.log(1.0 / (std + 1e-7)).reshape(1, c, 1, 1)
    out = jnp.exp(logs) * (h + t)
    logdet = logs.sum() * hh * ww
    return out, logdet


if __name__ == "__main__":
    key = jax.random.PRNGKey(0)
    N, C, H, W = 2, 4, 16, 16

    h = jax.random.normal(key, (N, C, H, W), dtype=jnp.float32) * 1.5 + 0.3
    # Parameters as in __init__: zeros of shape (1, C, 1, 1); initialized=False.
    t_param = jnp.zeros((1, C, 1, 1), dtype=jnp.float32)
    logs_param = jnp.zeros((1, C, 1, 1), dtype=jnp.float32)

    # First call: data-dependent init path (stats pass + affine pass).
    out, logdet, t_used, logs_used = glow_actnorm_forward(
        h, t_param, logs_param, initialized=False)
    jax.block_until_ready((out, logdet, t_used, logs_used))

    out_ref, logdet_ref = _reference(h, t_param, logs_param, initialized=False)
    assert jnp.allclose(out, out_ref, atol=1e-4, rtol=1e-4), "output mismatch"
    assert jnp.allclose(logdet, logdet_ref, atol=1e-3, rtol=1e-4), "logdet mismatch"

    # Steady state: initialized=True (affine-only path with given params).
    out2, logdet2, _, _ = glow_actnorm_forward(
        h, t_used, logs_used, initialized=True)
    jax.block_until_ready((out2, logdet2))
    assert jnp.allclose(out2, out, atol=1e-4, rtol=1e-4), "initialized-path mismatch"
    assert jnp.allclose(logdet2, logdet, atol=1e-3, rtol=1e-4), "initialized logdet mismatch"

    print("KERNEL_OK")
</pallas_src>

<mosaic_0001>
module attributes {stable_mosaic.version = 11 : i64} {
  func.func @_stats_kernel(%arg0: i32, %arg1: i32, %arg2: memref<1x4x256xf32, #tpu.memory_space<vmem>>, %arg3: memref<4x1xf32, #tpu.memory_space<vmem>>, %arg4: memref<4x1xf32, #tpu.memory_space<vmem>>, %arg5: memref<4x1xf32, #tpu.memory_space<vmem>>, %arg6: memref<4x1xf32, #tpu.memory_space<vmem>>) attributes {dimension_semantics = [#tpu.dimension_semantics<arbitrary>, #tpu.dimension_semantics<arbitrary>], iteration_bounds = array<i64: 2, 1>, scalar_prefetch = 0 : i64, scratch_operands = 2 : i64, tpu.core_type = #tpu.core_type<tc>, window_params = [{transform_indices = @transform_0, window_bounds = array<i64: 1, 4, 256>}, {pipeline_mode = #tpu.pipeline_mode<synchronous>, transform_indices = @transform_1, window_bounds = array<i64: 4, 1>}, {pipeline_mode = #tpu.pipeline_mode<synchronous>, transform_indices = @transform_2, window_bounds = array<i64: 4, 1>}]} {
    %c0_i32 = arith.constant 0 : i32
    %0 = arith.cmpi eq, %arg0, %c0_i32 : i32
    %c0_i32_0 = arith.constant 0 : i32
    %1 = arith.cmpi eq, %arg1, %c0_i32_0 : i32
    %2 = arith.andi %0, %1 : i1
    %c1_i32 = arith.constant 1 : i32
    %3 = arith.cmpi eq, %arg0, %c1_i32 : i32
    %c0_i32_1 = arith.constant 0 : i32
    %4 = arith.cmpi eq, %arg1, %c0_i32_1 : i32
    %5 = arith.andi %3, %4 : i1
    %6 = arith.extui %2 : i1 to i32
    %c0_i32_2 = arith.constant 0 : i32
    %7 = arith.cmpi ne, %6, %c0_i32_2 : i32
    scf.if %7 {
      %cst_15 = arith.constant 0.000000e+00 : f32
      %23 = vector.broadcast %cst_15 : f32 to vector<4x1xf32>
      %c0_16 = arith.constant 0 : index
      %c0_17 = arith.constant 0 : index
      %24 = vector.load %arg5[%c0_16, %c0_17] : memref<4x1xf32, #tpu.memory_space<vmem>>, vector<4x1xf32>
      tpu.vector_store %arg5[%c0_16, %c0_17], %23 {strides = array<i32>} : memref<4x1xf32, #tpu.memory_space<vmem>>, vector<4x1xf32>,
      %cst_18 = arith.constant 0.000000e+00 : f32
      %25 = vector.broadcast %cst_18 : f32 to vector<4x1xf32>
      %c0_19 = arith.constant 0 : index
      %c0_20 = arith.constant 0 : index
      %26 = vector.load %arg6[%c0_19, %c0_20] : memref<4x1xf32, #tpu.memory_space<vmem>>, vector<4x1xf32>
      tpu.vector_store %arg6[%c0_19, %c0_20], %25 {strides = array<i32>} : memref<4x1xf32, #tpu.memory_space<vmem>>, vector<4x1xf32>,
    } else {
    }
    %c0 = arith.constant 0 : index
    %c0_3 = arith.constant 0 : index
    %c0_4 = arith.constant 0 : index
    %8 = vector.load %arg2[%c0, %c0_3, %c0_4] : memref<1x4x256xf32, #tpu.memory_space<vmem>>, vector<1x4x256xf32>
    %9 = vector.shape_cast %8 : vector<1x4x256xf32> to vector<4x256xf32>
    %c0_5 = arith.constant 0 : index
    %c0_6 = arith.constant 0 : index
    %10 = vector.load %arg5[%c0_5, %c0_6] : memref<4x1xf32, #tpu.memory_space<vmem>>, vector<4x1xf32>
    %cst = arith.constant dense<0.000000e+00> : vector<4xf32>
    %11 = vector.multi_reduction <add>, %9, %cst [1] : vector<4x256xf32> to vector<4xf32>
    %12 = vector.shape_cast %11 : vector<4xf32> to vector<4x1xf32>
    %13 = arith.addf %10, %12 : vector<4x1xf32>
    %c0_7 = arith.constant 0 : index
    %c0_8 = arith.constant 0 : index
    %14 = vector.load %arg5[%c0_7, %c0_8] : memref<4x1xf32, #tpu.memory_space<vmem>>, vector<4x1xf32>
    tpu.vector_store %arg5[%c0_7, %c0_8], %13 {strides = array<i32>} : memref<4x1xf32, #tpu.memory_space<vmem>>, vector<4x1xf32>,
    %c0_9 = arith.constant 0 : index
    %c0_10 = arith.constant 0 : index
    %15 = vector.load %arg6[%c0_9, %c0_10] : memref<4x1xf32, #tpu.memory_space<vmem>>, vector<4x1xf32>
    %16 = arith.mulf %9, %9 : vector<4x256xf32>
    %cst_11 = arith.constant dense<0.000000e+00> : vector<4xf32>
    %17 = vector.multi_reduction <add>, %16, %cst_11 [1] : vector<4x256xf32> to vector<4xf32>
    %18 = vector.shape_cast %17 : vector<4xf32> to vector<4x1xf32>
    %19 = arith.addf %15, %18 : vector<4x1xf32>
    %c0_12 = arith.constant 0 : index
    %c0_13 = arith.constant 0 : index
    %20 = vector.load %arg6[%c0_12, %c0_13] : memref<4x1xf32, #tpu.memory_space<vmem>>, vector<4x1xf32>
    tpu.vector_store %arg6[%c0_12, %c0_13], %19 {strides = array<i32>} : memref<4x1xf32, #tpu.memory_space<vmem>>, vector<4x1xf32>,
    %21 = arith.extui %5 : i1 to i32
    %c0_i32_14 = arith.constant 0 : i32
    %22 = arith.cmpi ne, %21, %c0_i32_14 : i32
    scf.if %22 {
      %c0_15 = arith.constant 0 : index
      %c0_16 = arith.constant 0 : index
      %23 = vector.load %arg5[%c0_15, %c0_16] : memref<4x1xf32, #tpu.memory_space<vmem>>, vector<4x1xf32>
      %c0_17 = arith.constant 0 : index
      %c0_18 = arith.constant 0 : index
      %24 = vector.load %arg6[%c0_17, %c0_18] : memref<4x1xf32, #tpu.memory_space<vmem>>, vector<4x1xf32>
      %cst_19 = arith.constant 5.120000e+02 : f32
      %25 = vector.broadcast %cst_19 : f32 to vector<4x1xf32>
      %26 = arith.divf %23, %25 : vector<4x1xf32>
      %27 = arith.mulf %23, %23 : vector<4x1xf32>
      %cst_20 = arith.constant 5.120000e+02 : f32
      %28 = vector.broadcast %cst_20 : f32 to vector<4x1xf32>
      %29 = arith.divf %27, %28 : vector<4x1xf32>
      %30 = arith.subf %24, %29 : vector<4x1xf32>
      %cst_21 = arith.constant 5.110000e+02 : f32
      %31 = vector.broadcast %cst_21 : f32 to vector<4x1xf32>
      %32 = arith.divf %30, %31 : vector<4x1xf32>
      %cst_22 = arith.constant 0.000000e+00 : f32
      %33 = vector.broadcast %cst_22 : f32 to vector<4x1xf32>
      %34 = arith.maximumf %32, %33 : vector<4x1xf32>
      %35 = math.sqrt %34 : vector<4x1xf32>
      %cst_23 = arith.constant 0.000000e+00 : f32
      %36 = vector.broadcast %cst_23 : f32 to vector<4x1xf32>
      %37 = arith.subf %36, %26 : vector<4x1xf32>
      %c0_24 = arith.constant 0 : index
      %c0_25 = arith.constant 0 : index
      %38 = vector.load %arg3[%c0_24, %c0_25] : memref<4x1xf32, #tpu.memory_space<vmem>>, vector<4x1xf32>
      tpu.vector_store %arg3[%c0_24, %c0_25], %37 {strides = array<i32>} : memref<4x1xf32, #tpu.memory_space<vmem>>, vector<4x1xf32>,
      %cst_26 = arith.constant 1.000000e-07 : f32
      %39 = vector.broadcast %cst_26 : f32 to vector<4x1xf32>
      %40 = arith.addf %35, %39 : vector<4x1xf32>
      %41 = math.log %40 : vector<4x1xf32>
      %cst_27 = arith.constant 0.000000e+00 : f32
      %42 = vector.broadcast %cst_27 : f32 to vector<4x1xf32>
      %43 = arith.subf %42, %41 : vector<4x1xf32>
      %c0_28 = arith.constant 0 : index
      %c0_29 = arith.constant 0 : index
      %44 = vector.load %arg4[%c0_28, %c0_29] : memref<4x1xf32, #tpu.memory_space<vmem>>, vector<4x1xf32>
      tpu.vector_store %arg4[%c0_28, %c0_29], %43 {strides = array<i32>} : memref<4x1xf32, #tpu.memory_space<vmem>>, vector<4x1xf32>,
    } else {
    }
    return
  }
  func.func @transform_0(%arg0: i32, %arg1: i32) -> (i32, i32, i32) {
    %c0_i32 = arith.constant 0 : i32
    %c0_i32_0 = arith.constant 0 : i32
    return %arg0, %c0_i32, %arg1 : i32, i32, i32
  }
  func.func @transform_1(%arg0: i32, %arg1: i32) -> (i32, i32) {
    %c0_i32 = arith.constant 0 : i32
    %c0_i32_0 = arith.constant 0 : i32
    %c0_i32_1 = arith.constant 0 : i32
    return %c0_i32, %c0_i32_0 : i32, i32
  }
  func.func @transform_2(%arg0: i32, %arg1: i32) -> (i32, i32) {
    %c0_i32 = arith.constant 0 : i32
    %c0_i32_0 = arith.constant 0 : i32
    %c0_i32_1 = arith.constant 0 : i32
    return %c0_i32, %c0_i32_0 : i32, i32
  }
}

</mosaic_0001>

<bundles_post_ra>
// kernel: tpu_custom_call.1
= control target key start
LH: loop header
LB: loop body
LE: loop exit
PB: predicated region body
PF: predicated region fallthrough
CT: control target
= control target key end

     0   :  { %8 = vsyncpa [#allocation5], 0  ;;  %s586_s0 = inlined_call_operand.hbm [shape: f32[2,4,256], index: 0, kind: input, shape index: {}]   ;;  %s587_s1 = inlined_call_operand.vmem [shape: f32[4,1], index: 1, kind: output, shape index: {0}]   ;;  %s588_s2 = inlined_call_operand.vmem [shape: f32[4,1], index: 2, kind: output, shape index: {1}]  }
   0x1   :  { %10 = vsyncpa [#allocation5 + $0x1], 0  ;;  %s489_s9 = smov 0   ;;  %s491_s10 = smov 0  }
   0x2   :  { %s493_s11 = smov 0   ;;  %s495_s12 = smov 0  }
   0x3   :  { %s497_s13 = smov 0   ;;  %s499_s14 = smov 0  }
   0x4 LB: > { %s308_s15 = sadd.s32 4294967295, %s469_s14   ;;  %s28_s16 = sadd.s32 1, %s465_s13  ;;  %s469_s14 = sphi %s499_s14, %s16_s14   ;;  %s465_s13 = sphi %s497_s13, %s595_s13   ;;  %s461_s12 = sphi %s495_s12, %s594_s12   ;;  %s457_s11 = sphi %s493_s11, %s593_s11   ;;  %s453_s10 = sphi %s491_s10, %s592_s10   ;;  %s449_s9 = sphi %s489_s9, %s591_s9  }
   0x5   : > { %p30_p0 = scmp.ge.s32.totalorder %s28_s16, 2  ;;  %s37_s17 = sadd.s32 1, %s457_s11 }
   0x6   : > { %p44_p1 = scmp.ne.s32.totalorder %s457_s11, %s453_s10  ;;  %p45_p2 = scmp.eq.s32.totalorder %s469_s14, 0 }
   0x7   : > { %s597_s16 = smov (%p30_p0, %s28_s16), 0  ;;  %p50_p4 = scmp.ne.s32.totalorder %s453_s10, %s449_s9 }
   0x8   : > { %p525_p3 = por %p45_p2, %p44_p1  ;;  %s32_s19 = ssub.s32 %s465_s13, %s597_s16 }
   0x9   : > { %p51_p5 = scmp.eq.s32.totalorder %s308_s15, 0  ;;  %p35_p6 = scmp.eq.s32.totalorder %s32_s19, 0 }
   0xa   : > { %p329_p8 = scmp.lt.s32.totalorder %s469_s14, 2  ;;  %s116_s22 = sand.u32 1, %s457_s11  }
   0xb   : > { %p532_p7 = por %p51_p5, %p50_p4  ;;  %s320_s23 = sshll.u32 %s465_s13, 3 }
   0xc   : > { %s538_s21 = scalar_select %p35_p6, %s457_s11, %s37_s17  }
   0xd   : > { %s311_s24 = sshll.u32 %s116_s22, 3  ;;  %s127_s27 = scalar_lea.hbm %s586_s0, %s320_s23 }
   0xe   : > { %s129_s28 = sshll.u32 %s127_s27, 4  ;;  %s120_s29 = scalar_lea.vmem [#allocation4], %s311_s24  ;;  %s130_s28 = int_to_ptr.hbm [resolvable:$true] %s129_s28 }
   0xf   : > { %s131_s30 = sshll.u32 %s120_s29, 4  ;;  %p326_p9 = pnand %p329_p8, %p525_p3  ;;  %s132_s30 = int_to_ptr.vmem [resolvable:$true] %s131_s30 }
  0x10   : > { %p314_p10 = scmp.ge.s32.totalorder %s469_s14, 1  ;;  %p136_p11 = scmp.lt.s32.totalorder %s469_s14, 3 }
  0x11   : > { %s117_s3 = scalar_lea.sflag [#allocation5], %s116_s22 }
  0x12   : > { %328 = dma.hbm_to_vmem [thread:$0]  (!%p326_p9), %s130_s28, 128, %s132_s30, %s117_s3  }
  0x13   : > { %p137_p12 = pnand %p314_p10, %p136_p11 }
  0x14   : > { %s142_s4 = sand.u32 (!%p137_p12), 1, %s453_s10  }
  0x15   : > { %140 = sbr.rel (%p137_p12) target bundleno = 221 (0xdd), region = 24  ;;  %s315_s5 = sshll.u32 (!%p137_p12), %s142_s4, 3 }
  0x16   : > { %s143_s6 = scalar_lea.sflag (!%p137_p12), [#allocation5], %s142_s4  ;;  %s146_s7 = scalar_lea.vmem (!%p137_p12), [#allocation4], %s315_s5 }
  0x1a   : > { %444 = dma.done.wait (%p532_p7), %s143_s6, 128  }
  0x1b   : > { %446 = vsyncadd (%p532_p7), %s143_s6, 4294967168  ;;  %p164_p13 = scmp.eq.s32.totalorder %s461_s12, 0  ;;  %p168_p0 = scmp.eq.s32.totalorder %s461_s12, 1 }
  0x1c   : > { %vm173_vm0 = vcmask (%p164_p13), 3072   ;;  %v471_v0 = vmov (%p164_p13), 0.0  }
  0x1d   : > { %172 = sbr.rel (!%p164_p13) target bundleno = 34 (0x22), region = 32  ;;  %174 = vst.msk [vmem:[#allocation2] sm:$0xf] (%p164_p13), %vm173_vm0, %v471_v0 }
  0x1e   : > { %175 = vst.msk [vmem:[#allocation3] sm:$0xf] (%p164_p13), %vm173_vm0, %v471_v0 }
  0x22 PF: > { %v176_v1 = vld [vmem:[%s146_s7] sm:$0xff]  ;;  %vm184_vm1 = vcmask 1043456   ;;  %vm191_vm2 = vcmask 3072   ;;  %v472_v19 = vmov (%p168_p0), 512.0   ;;  %v473_v20 = vmov (%p168_p0), 511.0  }
  0x23   : > { %179 = vst [vmem:[#allocation1] ss:$2 sm:$0xff] %v176_v1  ;;  %v194_v2 = vmul.f32 %v176_v1, %v176_v1  ;;  %381 = vrcp.f32 (%p168_p0), %v472_v19 }
  0x24   : > { %v177_v13 = vld [vmem:[#allocation2] sm:$0xf]  ;;  %383 = vrcp.f32 (%p168_p0), %v473_v20 }
  0x25   : > { %v193_v16 = vld [vmem:[#allocation3] sm:$0xf] }
  0x29   : > { %v382_v21 = vpop.eup (%p168_p0), %381 }
  0x2a   : > { %v180_v3 = vld.sshfl [vmem:[#allocation1] sm:$0xff pattern:$0x75316420]  ;;  %v181_v4 = vld.sshfl [vmem:[#allocation1 + $0x8] sm:$0xff pattern:$0x75316420]  ;;  %v384_v22 = vpop.eup (%p168_p0), %383  ;;  %vm217_vm3 = vweird.f32 (%p168_p0), %v382_v21 }
  0x2b   : > { %v185_v5 = vsel %vm184_vm1, %v180_v3, 0.0  ;;  %v186_v6 = vsel %vm184_vm1, %v181_v4, 0.0  ;;  %196 = vst [vmem:[#allocation1] ss:$2 sm:$0xff] %v194_v2  ;;  %v213_v23 = vmul.f32 (%p168_p0), 512.0, %v382_v21  ;;  %v224_v24 = vmul.f32 (%p168_p0), 511.0, %v384_v22 }
  0x2c   : > { %v187_v7 = vadd.f32 %v186_v6, %v185_v5  ;;  %vm228_vm4 = vweird.f32 (%p168_p0), %v384_v22 }
  0x2d   : > { %v214_v26 = vsub.f32 (%p168_p0), 1.0, %v213_v23  ;;  %v225_v27 = vsub.f32 (%p168_p0), 1.0, %v224_v24 }
  0x2e   : > { %188 = vadd.xlane.f32.xlu0 %v187_v7 }
  0x2f   : > { %v215_v28 = vmul.f32 (%p168_p0), %v382_v21, %v214_v26  ;;  %v226_v30 = vmul.f32 (%p168_p0), %v384_v22, %v225_v27 }
  0x31   : > { %v216_v31 = vadd.f32 (%p168_p0), %v382_v21, %v215_v28  ;;  %v227_v32 = vadd.f32 (%p168_p0), %v384_v22, %v226_v30 }
  0x32   : > { %v197_v8 = vld.sshfl [vmem:[#allocation1] sm:$0xff pattern:$0x75316420]  ;;  %v198_v9 = vld.sshfl [vmem:[#allocation1 + $0x8] sm:$0xff pattern:$0x75316420] }
  0x33   : > { %v201_v10 = vsel %vm184_vm1, %v197_v8, 0.0  ;;  %v202_v11 = vsel %vm184_vm1, %v198_v9, 0.0  ;;  %v218_v34 = vsel (%p168_p0), %vm217_vm3, %v382_v21, %v216_v31  ;;  %v229_v37 = vsel (%p168_p0), %vm228_vm4, %v384_v22, %v227_v32 }
  0x34   : > { %v203_v12 = vadd.f32 %v202_v11, %v201_v10 }
  0x36   : > { %204 = vadd.xlane.f32.xlu0 %v203_v12 }
  0xa1   : > { %v189_v14 = vpop.xlane.xlu0 %188 }
  0xa2   : > { %v190_v15 = vadd.f32 %v189_v14, %v177_v13 }
  0xa4   : > { %192 = vst.msk [vmem:[#allocation2] sm:$0xf] %vm191_vm2, %v190_v15 }
  0xa8   : > { %209 = sbr.rel (!%p168_p0) target bundleno = 221 (0xdd), region = 36 }
  0xa9   : > { %v205_v17 = vpop.xlane.xlu0 %204 }
  0xaa   : > { %v206_v18 = vadd.f32 %v205_v17, %v193_v16 }
  0xab   : > { %v210_v25 = vld [vmem:[#allocation2] sm:$0xf] (%p168_p0) }
  0xac   : > { %207 = vst.msk [vmem:[#allocation3] sm:$0xf] %vm191_vm2, %v206_v18  ;;  %v220_v29 = vmul.f32 (%p168_p0), %v210_v25, %v210_v25  ;;  %v219_v35 = vmul.f32 (%p168_p0), %v218_v34, %v210_v25 }
  0xae   : > { %v221_v36 = vmul.f32 %v220_v29, %v218_v34  ;;  %v244_v39 = vsub.f32 0.0, %v219_v35 }
  0xb0   : > { %245 = vst.msk [vmem:[%s587_s1] sm:$0xf] %vm191_vm2, %v244_v39 }
  0xb3   : > { %v211_v33 = vld [vmem:[#allocation3] sm:$0xf] }
  0xb4   : > { %v222_v38 = vsub.f32 %v211_v33, %v221_v36 }
  0xb6   : > { %v230_v40 = vmul.f32 %v229_v37, %v222_v38 }
  0xb8   : > { %v231_v41 = vmax.f32 %v230_v40, 0.0 }
  0xba   : > { %385 = vrsqrt.f32 %v231_v41  ;;  %vm239_vm5 = vcmp.eq.f32.partialorder %v231_v41, inf  ;;  %v242_v48 = vand.u32 2147483648, %v231_v41  ;;  %vm241_vm6 = vcmp.eq.f32.partialorder %v231_v41, 0.0 }
  0xc0   : > { %v386_v42 = vpop.eup %385 }
  0xc1   : > { %v233_v43 = vmul.f32 %v386_v42, %v231_v41 }
  0xc3   : > { %v234_v44 = vmul.f32 %v386_v42, %v233_v43 }
  0xc5   : > { %v235_v45 = vmul.f32 0.5, %v234_v44 }
  0xc7   : > { %v236_v46 = vsub.f32 1.5, %v235_v45 }
  0xc9   : > { %v237_v47 = vmul.f32 %v386_v42, %v236_v46 }
  0xcb   : > { %v238_v49 = vmul.f32 %v237_v47, %v231_v41 }
  0xcd   : > { %v240_v50 = vsel %vm239_vm5, %v231_v41, %v238_v49 }
  0xce   : > { %v243_v51 = vsel %vm241_vm6, %v242_v48, %v240_v50 }
  0xcf   : > { %v246_v52 = vadd.f32 1e-07, %v243_v51 }
  0xd1   : > { %387 = vlog2.f32 %v246_v52 }
  0xd7   : > { %v388_v53 = vpop.eup %387 }
  0xd8   : > { %v248_v54 = vmul.f32 0.6931472, %v388_v53 }
  0xda   : > { %v249_v55 = vsub.f32 0.0, %v248_v54 }
  0xdc   : > { %250 = vst.msk [vmem:[%s588_s2] sm:$0xf] %vm191_vm2, %v249_v55 }
  0xdd PF: > { %s16_s14 = sadd.s32 1, %s469_s14   ;;  %s591_s9 = smov %s453_s10 }
  0xde   : > { %p13_p1 = scmp.ge.s32.totalorder %s16_s14, 4   ;;  %s592_s10 = smov %s457_s11 }
  0xdf   : > { %s593_s11 = smov %s538_s21  ;;  %s594_s12 = smov %s465_s13 }
  0xe0   : > { %s595_s13 = smov %s597_s16  ;;  %15 = sbr.rel (!%p13_p1) target bundleno = 4 (0x4), region = 76 }
  0xe5   :  { %268 = vsyncpa [#allocation5], 1 }
  0xe6   :  { %270 = vsyncpa [#allocation5 + $0x1], 1 }

</bundles_post_ra>
